<compile_context>
chip_gen: v6e
topology: v6e:2x2x1
jax: 0.10.0
libtpu: 0.0.40
codegen_flags: <defaults>
</compile_context>

<pallas_src>
import functools

import jax
import jax.numpy as jnp
from jax.experimental import pallas as pl
from jax.experimental.pallas import tpu as pltpu


# ---------------------------------------------------------------------------
# Kernels
# ---------------------------------------------------------------------------

def _policy_kernel_batch_lanes(x_ref, w1_ref, b1_ref, w2_ref, b2_ref,
                               w3_ref, b3_ref, out_ref):
    """Transposed layout: batch on the lane axis.

    x_ref : (F, tile_b)      f32
    w*    : (out, in)        bf16 (PyTorch orientation)
    b*    : (out, 1)         f32
    out   : (A, tile_b)      f32   -- lane-dense store
    """
    x = x_ref[...].astype(jnp.bfloat16)

    # dense1 + (dropout as identity) + relu
    h1 = jnp.dot(w1_ref[...], x, preferred_element_type=jnp.float32) + b1_ref[...]
    h1 = jnp.maximum(h1, 0.0)

    # dense2 + (dropout as identity) + relu
    h2 = jnp.dot(w2_ref[...], h1.astype(jnp.bfloat16),
                 preferred_element_type=jnp.float32) + b2_ref[...]
    h2 = jnp.maximum(h2, 0.0)

    # dense3
    logits = jnp.dot(w3_ref[...], h2.astype(jnp.bfloat16),
                     preferred_element_type=jnp.float32) + b3_ref[...]

    # softmax over the action axis (sublane axis here), numerically stable,
    # exact normalization (denominator is only (1, tile_b)).
    m = jnp.max(logits, axis=0, keepdims=True)
    e = jnp.exp(logits - m)
    denom = jnp.sum(e, axis=0, keepdims=True)
    out_ref[...] = (e / denom).astype(out_ref.dtype)


def _policy_kernel_batch_rows(x_ref, w1_ref, b1_ref, w2_ref, b2_ref,
                              w3_ref, b3_ref, out_ref):
    """Standard layout (used when F or A >= 128): batch on the sublane axis.

    x_ref : (tile_b, F)      f32
    w*    : (in, out)        bf16
    b*    : (1, out)         f32
    out   : (tile_b, A)      f32
    """
    x = x_ref[...].astype(jnp.bfloat16)

    h1 = jnp.dot(x, w1_ref[...], preferred_element_type=jnp.float32) + b1_ref[...]
    h1 = jnp.maximum(h1, 0.0)

    h2 = jnp.dot(h1.astype(jnp.bfloat16), w2_ref[...],
                 preferred_element_type=jnp.float32) + b2_ref[...]
    h2 = jnp.maximum(h2, 0.0)

    logits = jnp.dot(h2.astype(jnp.bfloat16), w3_ref[...],
                     preferred_element_type=jnp.float32) + b3_ref[...]

    m = jnp.max(logits, axis=-1, keepdims=True)
    e = jnp.exp(logits - m)
    denom = jnp.sum(e, axis=-1, keepdims=True)
    out_ref[...] = (e / denom).astype(out_ref.dtype)


# ---------------------------------------------------------------------------
# Wrapper
# ---------------------------------------------------------------------------

def _round_up(x, m):
    return ((x + m - 1) // m) * m


def _resident_spec(arr):
    # Constant index_map: block never changes across the batch grid.  Single
    # buffer -> half the VMEM residency of the default double-buffer.
    return pl.BlockSpec(arr.shape, lambda i: (0, 0), pipeline_mode=pl.Buffered(1))


@functools.partial(jax.jit, static_argnames=("tile_b",))
def dense_policy_forward(obs, params, *, tile_b=512):
    """obs: (B, F) float32; params: output of prepare_params() (bf16 weights)."""
    obs = obs.astype(jnp.float32)
    B, F = obs.shape

    w1, b1 = params["w1"], params["b1"]
    w2, b2 = params["w2"], params["b2"]
    w3, b3 = params["w3"], params["b3"]

    # Layout is encoded in the (one-time) param orientation from prepare_params:
    # transposed (batch-in-lanes) <=> w1 stored (32F, F).
    transposed = w1.shape == (32 * F, F)
    if transposed:
        A = w3.shape[0]
        align = 128        # batch is the lane axis
    else:
        A = w3.shape[1]
        align = 8          # batch is the sublane axis

    # --- batch tile selection ----------------------------------------------
    b_ceil = _round_up(B, align)
    tb = max(align, min((tile_b // align) * align, b_ceil))
    # v7x: keep >= 2 batch tiles when possible so ("parallel",) feeds both TCs.
    if b_ceil >= 2 * align and b_ceil // tb < 2:
        tb = max(align, ((b_ceil // 2) // align) * align)
    b_pad = _round_up(B, tb)
    grid = (b_pad // tb,)

    if b_pad != B:
        obs = jnp.pad(obs, ((0, b_pad - B), (0, 0)))

    compiler_params = pltpu.CompilerParams(
        dimension_semantics=("parallel",),       # shard batch tiles across TCs
        vmem_limit_bytes=64 * 1024 * 1024,
    )
    weight_specs = [_resident_spec(w1), _resident_spec(b1),
                    _resident_spec(w2), _resident_spec(b2),
                    _resident_spec(w3), _resident_spec(b3)]

    if transposed:
        obs_t = obs.T                                          # (F, b_pad)
        out_t = pl.pallas_call(
            _policy_kernel_batch_lanes,
            out_shape=jax.ShapeDtypeStruct((A, b_pad), jnp.float32),
            grid=grid,
            in_specs=[pl.BlockSpec((F, tb), lambda i: (0, i))] + weight_specs,
            out_specs=pl.BlockSpec((A, tb), lambda i: (0, i)),
            compiler_params=compiler_params,
        )(obs_t, w1, b1, w2, b2, w3, b3)
        return out_t.T[:B]
    else:
        out = pl.pallas_call(
            _policy_kernel_batch_rows,
            out_shape=jax.ShapeDtypeStruct((b_pad, A), jnp.float32),
            grid=grid,
            in_specs=[pl.BlockSpec((tb, F), lambda i: (i, 0))] + weight_specs,
            out_specs=pl.BlockSpec((tb, A), lambda i: (i, 0)),
            compiler_params=compiler_params,
        )(obs, w1, b1, w2, b2, w3, b3)
        return out[:B]


# ---------------------------------------------------------------------------
# Parameter handling
# ---------------------------------------------------------------------------

def init_params(key, input_features, action_nums):
    """Deterministic f32 init mimicking nn.Linear default (uniform +-1/sqrt(fan_in)).

    Stored (in_features, out_features) with (1, out) biases (reference layout).
    """
    dims = [
        (input_features, input_features * 32),   # dense1
        (input_features * 32, action_nums * 8),  # dense2
        (action_nums * 8, action_nums),          # dense3
    ]
    params = {}
    keys = jax.random.split(key, 2 * len(dims))
    for i, (fan_in, fan_out) in enumerate(dims):
        bound = 1.0 / jnp.sqrt(jnp.float32(fan_in))
        w = jax.random.uniform(keys[2 * i], (fan_in, fan_out), jnp.float32, -bound, bound)
        b = jax.random.uniform(keys[2 * i + 1], (1, fan_out), jnp.float32, -bound, bound)
        params[f"w{i + 1}"] = w
        params[f"b{i + 1}"] = b
    return params


def prepare_params(params_f32, input_features, action_nums):
    """ONE-TIME cast + layout for the kernel (do this at checkpoint-load time).

    Weights -> bf16 on the MXU path; biases stay f32 for the f32 bias-add.
    If both F and A are below a 128-lane vreg, weights are stored
    (out_features, in_features) so the kernel runs batch-in-lanes.
    """
    transposed = input_features < 128 and action_nums < 128
    prepared = {}
    for i in (1, 2, 3):
        w = params_f32[f"w{i}"]              # (in, out)
        b = params_f32[f"b{i}"].reshape(-1)  # (out,)
        if transposed:
            prepared[f"w{i}"] = jnp.asarray(w.T, dtype=jnp.bfloat16)          # (out, in)
            prepared[f"b{i}"] = jnp.asarray(b.reshape(-1, 1), dtype=jnp.float32)
        else:
            prepared[f"w{i}"] = jnp.asarray(w, dtype=jnp.bfloat16)            # (in, out)
            prepared[f"b{i}"] = jnp.asarray(b.reshape(1, -1), dtype=jnp.float32)
    return prepared


def _reference_forward(obs, params_f32):
    """Pure-JAX f32 reference of Dense_Policy.forward (dropout = identity)."""
    h1 = jnp.maximum(obs @ params_f32["w1"] + params_f32["b1"], 0.0)
    h2 = jnp.maximum(h1 @ params_f32["w2"] + params_f32["b2"], 0.0)
    logits = h2 @ params_f32["w3"] + params_f32["b3"]
    return jax.nn.softmax(logits, axis=1)


if __name__ == "__main__":
    input_features = 4
    action_nums = 4
    batch = 2

    key = jax.random.PRNGKey(0)
    k_params, k_obs = jax.random.split(key)

    params_f32 = init_params(k_params, input_features, action_nums)
    params = prepare_params(params_f32, input_features, action_nums)  # one-time bf16 cast
    obs = jax.random.normal(k_obs, (batch, input_features), dtype=jnp.float32)

    probs = dense_policy_forward(obs, params)
    probs = jax.block_until_ready(probs)

    # sanity: shape, valid probability rows (exact normalization in-kernel)
    assert probs.shape == (batch, action_nums)
    assert bool(jnp.all(probs >= 0.0))
    assert bool(jnp.all(jnp.abs(jnp.sum(probs, axis=1) - 1.0) < 1e-4))

    # sanity: close to the f32 reference (bf16 matmul path -> loose tolerance)
    ref = _reference_forward(obs, params_f32)
    assert bool(jnp.max(jnp.abs(probs - ref)) < 5e-2)

    print("KERNEL_OK")
</pallas_src>

<mosaic_0001>
module attributes {stable_mosaic.version = 11 : i64} {
  func.func @_policy_kernel_batch_lanes(%arg0: i32, %arg1: memref<4x128xf32, #tpu.memory_space<vmem>>, %arg2: memref<128x4xbf16, #tpu.memory_space<vmem>>, %arg3: memref<128x1xf32, #tpu.memory_space<vmem>>, %arg4: memref<32x128xbf16, #tpu.memory_space<vmem>>, %arg5: memref<32x1xf32, #tpu.memory_space<vmem>>, %arg6: memref<4x32xbf16, #tpu.memory_space<vmem>>, %arg7: memref<4x1xf32, #tpu.memory_space<vmem>>, %arg8: memref<4x128xf32, #tpu.memory_space<vmem>>) attributes {dimension_semantics = [#tpu.dimension_semantics<parallel>], iteration_bounds = array<i64: 1>, scalar_prefetch = 0 : i64, scratch_operands = 0 : i64, tpu.core_type = #tpu.core_type<tc>, window_params = [{transform_indices = @transform_0, window_bounds = array<i64: 4, 128>}, {pipeline_mode = #tpu.pipeline_mode<synchronous>, transform_indices = @transform_1, window_bounds = array<i64: 128, 4>}, {pipeline_mode = #tpu.pipeline_mode<synchronous>, transform_indices = @transform_2, window_bounds = array<i64: 128, 1>}, {pipeline_mode = #tpu.pipeline_mode<synchronous>, transform_indices = @transform_3, window_bounds = array<i64: 32, 128>}, {pipeline_mode = #tpu.pipeline_mode<synchronous>, transform_indices = @transform_4, window_bounds = array<i64: 32, 1>}, {pipeline_mode = #tpu.pipeline_mode<synchronous>, transform_indices = @transform_5, window_bounds = array<i64: 4, 32>}, {pipeline_mode = #tpu.pipeline_mode<synchronous>, transform_indices = @transform_6, window_bounds = array<i64: 4, 1>}, {transform_indices = @transform_7, window_bounds = array<i64: 4, 128>}]} {
    %c0 = arith.constant 0 : index
    %c0_0 = arith.constant 0 : index
    %0 = vector.load %arg1[%c0, %c0_0] : memref<4x128xf32, #tpu.memory_space<vmem>>, vector<4x128xf32>
    %1 = arith.truncf %0 : vector<4x128xf32> to vector<4x128xbf16>
    %c0_1 = arith.constant 0 : index
    %c0_2 = arith.constant 0 : index
    %2 = vector.load %arg2[%c0_1, %c0_2] : memref<128x4xbf16, #tpu.memory_space<vmem>>, vector<128x4xbf16>
    %cst = arith.constant dense<0.000000e+00> : vector<128x128xf32>
    %3 = tpu.matmul %2, %1, %cst {dimension_numbers = #tpu.dot_dimension_numbers<[1], [0], [0], [1], [0, 0, 1, 1], [], []>} : vector<128x4xbf16>, vector<4x128xbf16>, vector<128x128xf32> -> vector<128x128xf32>
    %c0_3 = arith.constant 0 : index
    %c0_4 = arith.constant 0 : index
    %4 = vector.load %arg3[%c0_3, %c0_4] : memref<128x1xf32, #tpu.memory_space<vmem>>, vector<128x1xf32>
    %5 = vector.broadcast %4 : vector<128x1xf32> to vector<128x128xf32>
    %6 = arith.addf %3, %5 : vector<128x128xf32>
    %cst_5 = arith.constant 0.000000e+00 : f32
    %7 = vector.broadcast %cst_5 : f32 to vector<128x128xf32>
    %8 = arith.maximumf %6, %7 : vector<128x128xf32>
    %c0_6 = arith.constant 0 : index
    %c0_7 = arith.constant 0 : index
    %9 = vector.load %arg4[%c0_6, %c0_7] : memref<32x128xbf16, #tpu.memory_space<vmem>>, vector<32x128xbf16>
    %10 = arith.truncf %8 : vector<128x128xf32> to vector<128x128xbf16>
    %cst_8 = arith.constant dense<0.000000e+00> : vector<32x128xf32>
    %11 = tpu.matmul %9, %10, %cst_8 {dimension_numbers = #tpu.dot_dimension_numbers<[1], [0], [0], [1], [0, 0, 1, 1], [], []>} : vector<32x128xbf16>, vector<128x128xbf16>, vector<32x128xf32> -> vector<32x128xf32>
    %c0_9 = arith.constant 0 : index
    %c0_10 = arith.constant 0 : index
    %12 = vector.load %arg5[%c0_9, %c0_10] : memref<32x1xf32, #tpu.memory_space<vmem>>, vector<32x1xf32>
    %13 = vector.broadcast %12 : vector<32x1xf32> to vector<32x128xf32>
    %14 = arith.addf %11, %13 : vector<32x128xf32>
    %cst_11 = arith.constant 0.000000e+00 : f32
    %15 = vector.broadcast %cst_11 : f32 to vector<32x128xf32>
    %16 = arith.maximumf %14, %15 : vector<32x128xf32>
    %c0_12 = arith.constant 0 : index
    %c0_13 = arith.constant 0 : index
    %17 = vector.load %arg6[%c0_12, %c0_13] : memref<4x32xbf16, #tpu.memory_space<vmem>>, vector<4x32xbf16>
    %18 = arith.truncf %16 : vector<32x128xf32> to vector<32x128xbf16>
    %cst_14 = arith.constant dense<0.000000e+00> : vector<4x128xf32>
    %19 = tpu.matmul %17, %18, %cst_14 {dimension_numbers = #tpu.dot_dimension_numbers<[1], [0], [0], [1], [0, 0, 1, 1], [], []>} : vector<4x32xbf16>, vector<32x128xbf16>, vector<4x128xf32> -> vector<4x128xf32>
    %c0_15 = arith.constant 0 : index
    %c0_16 = arith.constant 0 : index
    %20 = vector.load %arg7[%c0_15, %c0_16] : memref<4x1xf32, #tpu.memory_space<vmem>>, vector<4x1xf32>
    %21 = vector.broadcast %20 : vector<4x1xf32> to vector<4x128xf32>
    %22 = arith.addf %19, %21 : vector<4x128xf32>
    %cst_17 = arith.constant dense<0xFF800000> : vector<128xf32>
    %23 = vector.multi_reduction <maximumf>, %22, %cst_17 [0] : vector<4x128xf32> to vector<128xf32>
    %24 = vector.shape_cast %23 : vector<128xf32> to vector<1x128xf32>
    %25 = vector.broadcast %24 : vector<1x128xf32> to vector<4x128xf32>
    %26 = arith.subf %22, %25 : vector<4x128xf32>
    %27 = math.exp %26 : vector<4x128xf32>
    %cst_18 = arith.constant dense<0.000000e+00> : vector<128xf32>
    %28 = vector.multi_reduction <add>, %27, %cst_18 [0] : vector<4x128xf32> to vector<128xf32>
    %29 = vector.shape_cast %28 : vector<128xf32> to vector<1x128xf32>
    %30 = vector.broadcast %29 : vector<1x128xf32> to vector<4x128xf32>
    %31 = arith.divf %27, %30 : vector<4x128xf32>
    %c0_19 = arith.constant 0 : index
    %c0_20 = arith.constant 0 : index
    %32 = vector.load %arg8[%c0_19, %c0_20] : memref<4x128xf32, #tpu.memory_space<vmem>>, vector<4x128xf32>
    tpu.vector_store %arg8[%c0_19, %c0_20], %31 {strides = array<i32>} : memref<4x128xf32, #tpu.memory_space<vmem>>, vector<4x128xf32>,
    return
  }
  func.func @transform_0(%arg0: i32) -> (i32, i32) {
    %c0_i32 = arith.constant 0 : i32
    %c0_i32_0 = arith.constant 0 : i32
    return %c0_i32, %arg0 : i32, i32
  }
  func.func @transform_1(%arg0: i32) -> (i32, i32) {
    %c0_i32 = arith.constant 0 : i32
    %c0_i32_0 = arith.constant 0 : i32
    %c0_i32_1 = arith.constant 0 : i32
    return %c0_i32, %c0_i32_0 : i32, i32
  }
  func.func @transform_2(%arg0: i32) -> (i32, i32) {
    %c0_i32 = arith.constant 0 : i32
    %c0_i32_0 = arith.constant 0 : i32
    %c0_i32_1 = arith.constant 0 : i32
    return %c0_i32, %c0_i32_0 : i32, i32
  }
  func.func @transform_3(%arg0: i32) -> (i32, i32) {
    %c0_i32 = arith.constant 0 : i32
    %c0_i32_0 = arith.constant 0 : i32
    %c0_i32_1 = arith.constant 0 : i32
    return %c0_i32, %c0_i32_0 : i32, i32
  }
  func.func @transform_4(%arg0: i32) -> (i32, i32) {
    %c0_i32 = arith.constant 0 : i32
    %c0_i32_0 = arith.constant 0 : i32
    %c0_i32_1 = arith.constant 0 : i32
    return %c0_i32, %c0_i32_0 : i32, i32
  }
  func.func @transform_5(%arg0: i32) -> (i32, i32) {
    %c0_i32 = arith.constant 0 : i32
    %c0_i32_0 = arith.constant 0 : i32
    %c0_i32_1 = arith.constant 0 : i32
    return %c0_i32, %c0_i32_0 : i32, i32
  }
  func.func @transform_6(%arg0: i32) -> (i32, i32) {
    %c0_i32 = arith.constant 0 : i32
    %c0_i32_0 = arith.constant 0 : i32
    %c0_i32_1 = arith.constant 0 : i32
    return %c0_i32, %c0_i32_0 : i32, i32
  }
  func.func @transform_7(%arg0: i32) -> (i32, i32) {
    %c0_i32 = arith.constant 0 : i32
    %c0_i32_0 = arith.constant 0 : i32
    return %c0_i32, %arg0 : i32, i32
  }
}

</mosaic_0001>

<bundles_post_ra>
// kernel: dense_policy_forward.1
= control target key start
LH: loop header
LB: loop body
LE: loop exit
PB: predicated region body
PF: predicated region fallthrough
CT: control target
= control target key end

     0   :  { %vm206_vm0 = vcmask 1041408   ;;  %vm181_vm1 = vcmask 31744   ;;  %v609_v1 = vmov 0   ;;  %vm611_vm2 = vmmov 0   ;;  %s773_s0 = inlined_call_operand.vmem [shape: f32[4,128], index: 0, kind: input, shape index: {}]   ;;  %s774_s1 = inlined_call_operand.vmem [shape: bf16[128,4], index: 1, kind: input, shape index: {}]   ;;  %s775_s2 = inlined_call_operand.vmem [shape: f32[128,1], index: 2, kind: input, shape index: {}]   ;;  %s776_s4 = inlined_call_operand.vmem [shape: f32[32,1], index: 4, kind: input, shape index: {}]   ;;  %s777_s6 = inlined_call_operand.vmem [shape: f32[4,1], index: 6, kind: input, shape index: {}]   ;;  %s778_s3 = inlined_call_operand.vmem [shape: bf16[32,128], index: 3, kind: input, shape index: {}]   ;;  %s779_s5 = inlined_call_operand.vmem [shape: bf16[4,32], index: 5, kind: input, shape index: {}]   ;;  %s780_s7 = inlined_call_operand.vmem [shape: f32[4,128], index: 7, kind: output, shape index: {}]  }
   0x1   :  { %v27_v0 = vld [vmem:[%s773_s0] sm:$0xf]  ;;  %593 = vset.pattern.permute.xlu0 %v609_v1  ;;  %594 = vset.pattern.permute.xlu1 %v609_v1  ;;  %v596_v5 = vld [vmem:[%s774_s1 + $0x8] sm:$0xff]   ;;  %v597_v6 = vld [vmem:[%s774_s1 + $0x10] sm:$0xff]   ;;  %vm433_vm3 = vcmask 261120   ;;  %vm477_vm4 = vcmask 1043456  }
   0x2   :  { %v28_v2 = vpack.c.bf16 %v27_v0, %v27_v0  ;;  %v595_v3 = vld [vmem:[%s774_s1] sm:$0xff]   ;;  %v59_v7 = vld [vmem:[%s775_s2 + $0x70] sm:$0xff]  ;;  %v60_v9 = vld [vmem:[%s775_s2 + $0x78] sm:$0xff] }
   0x3   :  { %545 = vmatprep.mubr.msk.bf16.mxu0 %vm181_vm1, %v595_v3  ;;  %133 = vperm.xlu0 %593, %v59_v7   ;;  %v57_v8 = vld [vmem:[%s775_s2 + $0x60] sm:$0xff]  ;;  %v598_v10 = vld [vmem:[%s774_s1 + $0x18] sm:$0xff]   ;;  %v58_v11 = vld [vmem:[%s775_s2 + $0x68] sm:$0xff] }
   0x4   :  { %589 = vmatprep.subr.msk.bf16.mxu0 %vm206_vm0, %v28_v2  ;;  %v208_v4 = vsel %vm206_vm0, %v28_v2, 0  ;;  %123 = vperm.xlu1 %594, %v57_v8   ;;  %v599_v12 = vld [vmem:[%s774_s1 + $0x20] sm:$0xff]   ;;  %v55_v13 = vld [vmem:[%s775_s2 + $0x50] sm:$0xff]  ;;  %v56_v14 = vld [vmem:[%s775_s2 + $0x58] sm:$0xff] }
   0x5   :  { %544 = vmatpush3.bf16.msra.mxu0 %v208_v4  ;;  %v53_v15 = vld [vmem:[%s775_s2 + $0x40] sm:$0xff]  ;;  %v600_v16 = vld [vmem:[%s774_s1 + $0x28] sm:$0xff]   ;;  %v601_v18 = vld [vmem:[%s774_s1 + $0x30] sm:$0xff]  }
   0x6   :  { %v54_v17 = vld [vmem:[%s775_s2 + $0x48] sm:$0xff]  ;;  %v51_v19 = vld [vmem:[%s775_s2 + $0x30] sm:$0xff]  ;;  %v52_v20 = vld [vmem:[%s775_s2 + $0x38] sm:$0xff] }
   0x7   :  { %138 = vperm.xlu0 %593, %v60_v9   ;;  %v49_v21 = vld [vmem:[%s775_s2 + $0x20] sm:$0xff]  ;;  %v602_v22 = vld [vmem:[%s774_s1 + $0x38] sm:$0xff]   ;;  %v50_v23 = vld [vmem:[%s775_s2 + $0x28] sm:$0xff] }
   0x8   :  { %546 = vmatmul.mubr.msk.bf16.vlgmr.msra.gmra.mxu0 %vm181_vm1, %v596_v5  ;;  %128 = vperm.xlu1 %594, %v58_v11   ;;  %v47_v24 = vld [vmem:[%s775_s2 + $0x10] sm:$0xff]  ;;  %v48_v25 = vld [vmem:[%s775_s2 + $0x18] sm:$0xff]  ;;  %v45_v26 = vld [vmem:[%s775_s2] sm:$0xff] }
   0x9   :  { %549 = vmatprep.mubr.msk.bf16.mxu0 %vm181_vm1, %v597_v6  ;;  %v46_v27 = vld [vmem:[%s775_s2 + $0x8] sm:$0xff]  ;;  %v337_v28 = vld [vmem:[%s776_s4 + $0x10] sm:$0xff]  ;;  %v338_v29 = vld [vmem:[%s776_s4 + $0x18] sm:$0xff] }
   0xa   :  { %v335_v30 = vld [vmem:[%s776_s4] sm:$0xff]  ;;  %v336_v31 = vld [vmem:[%s776_s4 + $0x8] sm:$0xff] }
   0xb   :  { %113 = vperm.xlu0 %593, %v55_v13   ;;  %v427_v32 = vld [vmem:[%s777_s6] sm:$0xf] }
   0xc   :  { %118 = vperm.xlu1 %594, %v56_v14   ;;  %v603_v33 = vld [vmem:[%s778_s3] sm:$0xff]  }
   0xd   :  { %577 = vmatprep.mubr.bf16.mxu1 %v603_v33 }
   0xf   :  { %103 = vperm.xlu0 %593, %v53_v15  }
  0x10   :  { %550 = vmatmul.mubr.msk.bf16.gmra.mxu0 %vm181_vm1, %v598_v10  ;;  %108 = vperm.xlu1 %594, %v54_v17  }
  0x11   :  { %553 = vmatprep.mubr.msk.bf16.mxu0 %vm181_vm1, %v599_v12 }
  0x13   :  { %93 = vperm.xlu0 %593, %v51_v19  }
  0x14   :  { %98 = vperm.xlu1 %594, %v52_v20  }
  0x17   :  { %83 = vperm.xlu0 %593, %v49_v21  }
  0x18   :  { %554 = vmatmul.mubr.msk.bf16.gmra.mxu0 %vm181_vm1, %v600_v16  ;;  %88 = vperm.xlu1 %594, %v50_v23  }
  0x19   :  { %557 = vmatprep.mubr.msk.bf16.mxu0 %vm181_vm1, %v601_v18 }
  0x1b   :  { %73 = vperm.xlu0 %593, %v47_v24  }
  0x1c   :  { %78 = vperm.xlu1 %594, %v48_v25  }
  0x1f   :  { %63 = vperm.xlu0 %593, %v45_v26  }
  0x20   :  { %558 = vmatmul.mubr.msk.bf16.gmra.mxu0 %vm181_vm1, %v602_v22  ;;  %68 = vperm.xlu1 %594, %v46_v27  }
  0x23   :  { %351 = vperm.xlu0 %593, %v337_v28  }
  0x24   :  { %356 = vperm.xlu1 %594, %v338_v29  }
  0x27   :  { %341 = vperm.xlu0 %593, %v335_v30  }
  0x28   :  { %346 = vperm.xlu1 %594, %v336_v31  }
  0x2b   :  { %430 = vperm.xlu0 %593, %v427_v32  }
  0x7e   :  { %v134_v39 = vpop.permute.xlu0 %133 }
  0x7f   :  { %v124_v37 = vpop.permute.xlu1 %123 }
  0x82   :  { %v139_v44 = vpop.permute.xlu0 %138 }
  0x83   :  { %v129_v42 = vpop.permute.xlu1 %128 }
  0x86   :  { %v114_v49 = vpop.permute.xlu0 %113 }
  0x87   :  { %v119_v47 = vpop.permute.xlu1 %118 }
  0x8a   :  { %v104_v54 = vpop.permute.xlu0 %103 }
  0x8b   :  { %v109_v52 = vpop.permute.xlu1 %108 }
  0x8e   :  { %v94_v2 = vpop.permute.xlu0 %93 }
  0x8f   :  { %v99_v60 = vpop.permute.xlu1 %98 }
  0x92   :  { %v84_v13 = vpop.permute.xlu0 %83 }
  0x93   :  { %v89_v10 = vpop.permute.xlu1 %88 }
  0x96   :  { %v74_v23 = vpop.permute.xlu0 %73 }
  0x97   :  { %v79_v19 = vpop.permute.xlu1 %78 }
  0x9a   :  { %v64_v32 = vpop.permute.xlu0 %63 }
  0x9b   :  { %v69_v29 = vpop.permute.xlu1 %68 }
  0xc8   :  { %v753_v34 = vpop.f32.mrf.mxu0 }
  0xc9   :  { %v253_v30 = vadd.f32 %v753_v34, %v74_v23  ;;  %v604_v34 = vld [vmem:[%s778_s3 + $0x8] sm:$0xff]  }
  0xca   :  { %v755_v35 = vpop.f32.mrf.mxu0 }
  0xcc   :  { %v548_v36 = vpop.f32.mrf.mxu0 }
  0xcd   :  { %v256_v26 = vadd.f32 %v548_v36, %v79_v19 }
  0xce   :  { %v757_v38 = vpop.f32.mrf.mxu0 }
  0xcf   :  { %v310_v33 = vmax.f32 %v256_v26, 0.0 }
  0xd0   :  { %v551_v40 = vpop.f32.mrf.mxu0 }
  0xd1   :  { %v269_v17 = vadd.f32 %v551_v40, %v94_v2  ;;  %v309_v40 = vmax.f32 %v253_v30, 0.0 }
  0xd2   :  { %v260_v41 = vpop.f32.mrf.mxu0 }
  0xd3   :  { %v313_v24 = vmax.f32 %v269_v17, 0.0  ;;  %v261_v25 = vadd.f32 %v260_v41, %v84_v13  ;;  %v328_v41 = vpack.c.bf16 %v310_v33, %v309_v40 }
  0xd4   :  { %v552_v43 = vpop.f32.mrf.mxu0 }
  0xd5   :  { %v272_v14 = vadd.f32 %v552_v43, %v99_v60  ;;  %v311_v31 = vmax.f32 %v261_v25, 0.0 }
  0xd6   :  { %v263_v45 = vpop.f32.mrf.mxu0 }
  0xd7   :  { %v314_v20 = vmax.f32 %v272_v14, 0.0  ;;  %v264_v21 = vadd.f32 %v263_v45, %v89_v10  ;;  %v357_v45 = vpop.permute.xlu1 %356 }
  0xd8   :  { %v555_v46 = vpop.f32.mrf.mxu0 }
  0xd9   :  { %v285_v3 = vadd.f32 %v555_v46, %v114_v49  ;;  %v330_v27 = vpack.c.bf16 %v314_v20, %v313_v24  ;;  %v312_v28 = vmax.f32 %v264_v21, 0.0 }
  0xda   :  { %v276_v48 = vpop.f32.mrf.mxu0 }
  0xdb   :  { %v317_v11 = vmax.f32 %v285_v3, 0.0  ;;  %v277_v12 = vadd.f32 %v276_v48, %v104_v54 }
  0xdc   :  { %v556_v50 = vpop.f32.mrf.mxu0 }
  0xdd   :  { %v288_v62 = vadd.f32 %v556_v50, %v119_v47  ;;  %v315_v18 = vmax.f32 %v277_v12, 0.0 }
  0xde   :  { %v279_v51 = vpop.f32.mrf.mxu0 }
  0xdf   :  { %v318_v7 = vmax.f32 %v288_v62, 0.0  ;;  %v280_v8 = vadd.f32 %v279_v51, %v109_v52  ;;  %v347_v52 = vpop.permute.xlu1 %346  ;;  %v424_v62 = vld [vmem:[%s779_s5] sm:$0x3] }
  0xe0   :  { %v559_v53 = vpop.f32.mrf.mxu0 }
  0xe1   :  { %v301_v56 = vadd.f32 %v559_v53, %v134_v39  ;;  %v332_v15 = vpack.c.bf16 %v318_v7, %v317_v11  ;;  %v316_v16 = vmax.f32 %v280_v8, 0.0  ;;  %v329_v39 = vpack.c.bf16 %v312_v28, %v311_v31 }
  0xe2   :  { %v292_v55 = vpop.f32.mrf.mxu0 }
  0xe3   :  { %v293_v58 = vadd.f32 %v292_v55, %v124_v37  ;;  %v321_v63 = vmax.f32 %v301_v56, 0.0  ;;  %v331_v22 = vpack.c.bf16 %v316_v16, %v315_v18  ;;  %v248_v37 = vadd.f32 %v757_v38, %v69_v29 }
  0xe4   :  { %v560_v57 = vpop.f32.mrf.mxu0  ;;  %v610_v38 = vmov 0.0  }
  0xe5   :  { %v304_v59 = vadd.f32 %v560_v57, %v139_v44  ;;  %v319_v4 = vmax.f32 %v293_v58, 0.0  ;;  %v308_v36 = vmax.f32 %v248_v37, 0.0  ;;  %581 = vmatprep.subr.bf16.mxu0 %v610_v38  ;;  %585 = vmatprep.mubr.msk.bf16.mxu0 %vm611_vm2, %v610_v38 }
  0xe6   :  { %v295_v61 = vpop.f32.mrf.mxu0 }
  0xe7   :  { %v322_v0 = vmax.f32 %v304_v59, 0.0  ;;  %v296_v1 = vadd.f32 %v295_v61, %v129_v42  ;;  %v245_v42 = vadd.f32 %v755_v35, %v64_v32  ;;  %v352_v35 = vpop.permute.xlu0 %351 }
  0xe9   :  { %v320_v5 = vmax.f32 %v296_v1, 0.0  ;;  %v334_v6 = vpack.c.bf16 %v322_v0, %v321_v63  ;;  %v307_v43 = vmax.f32 %v245_v42, 0.0 }
  0xeb   :  { %v333_v9 = vpack.c.bf16 %v320_v5, %v319_v4  ;;  %561 = vmatprep.subr.bf16.mxu1 %v334_v6  ;;  %v327_v44 = vpack.c.bf16 %v308_v36, %v307_v43  ;;  %v342_v50 = vpop.permute.xlu0 %341 }
  0xec   :  { %562 = vmatpush3.bf16.msra.mxu1 %v334_v6 }
  0xed   :  { %563 = vmatprep.subr.bf16.mxu1 %v333_v9 }
  0xef   :  { %v431_v63 = vpop.permute.xlu0 %430 }
  0xf0   :  { %564 = vmatpush3.bf16.msra.mxu1 %v333_v9 }
  0xf1   :  { %565 = vmatprep.subr.bf16.mxu1 %v332_v15 }
  0xf4   :  { %566 = vmatpush3.bf16.msra.mxu1 %v332_v15 }
  0xf5   :  { %567 = vmatprep.subr.bf16.mxu1 %v331_v22 }
  0xf8   :  { %568 = vmatpush3.bf16.msra.mxu1 %v331_v22 }
  0xf9   :  { %569 = vmatprep.subr.bf16.mxu1 %v330_v27 }
  0xfc   :  { %570 = vmatpush3.bf16.msra.mxu1 %v330_v27 }
  0xfd   :  { %571 = vmatprep.subr.bf16.mxu1 %v329_v39 }
 0x100   :  { %572 = vmatpush3.bf16.msra.mxu1 %v329_v39 }
 0x101   :  { %573 = vmatprep.subr.bf16.mxu1 %v328_v41 }
 0x104   :  { %574 = vmatpush3.bf16.msra.mxu1 %v328_v41 }
 0x105   :  { %575 = vmatprep.subr.bf16.mxu1 %v327_v44 }
 0x108   :  { %576 = vmatpush3.bf16.msra.mxu1 %v327_v44 }
 0x10b   :  { %578 = vmatmul.mubr.bf16.vlgmr.msra.gmra.mxu1 %v604_v34 }
 0x1cb   :  { %v579_v46 = vpop.f32.mrf.mxu1 }
 0x1cc   :  { %v414_v48 = vadd.f32 %v579_v46, %v352_v35 }
 0x1cd   :  { %v405_v47 = vpop.f32.mrf.mxu1 }
 0x1ce   :  { %v422_v54 = vmax.f32 %v414_v48, 0.0  ;;  %v406_v55 = vadd.f32 %v405_v47, %v342_v50 }
 0x1cf   :  { %v580_v49 = vpop.f32.mrf.mxu1 }
 0x1d0   :  { %v417_v51 = vadd.f32 %v580_v49, %v357_v45  ;;  %v420_v60 = vmax.f32 %v406_v55, 0.0 }
 0x1d1   :  { %v408_v53 = vpop.f32.mrf.mxu1 }
 0x1d2   :  { %v423_v56 = vmax.f32 %v417_v51, 0.0  ;;  %v409_v57 = vadd.f32 %v408_v53, %v347_v52 }
 0x1d4   :  { %v426_v58 = vpack.c.bf16 %v423_v56, %v422_v54  ;;  %v421_v59 = vmax.f32 %v409_v57, 0.0 }
 0x1d6   :  { %582 = vmatpush3.bf16.msra.mxu0 %v426_v58  ;;  %v425_v61 = vpack.c.bf16 %v421_v59, %v420_v60 }
 0x1d7   :  { %583 = vmatprep.subr.bf16.mxu0 %v610_v38 }
 0x1da   :  { %584 = vmatpush3.bf16.msra.mxu0 %v425_v61 }
 0x1dd   :  { %586 = vmatmul.mubr.msk.bf16.vlgmr.msra.gmra.mxu0 %vm433_vm3, %v424_v62 }
 0x29d   :  { %v471_v0 = vpop.f32.mrf.mxu0 }
 0x29e   :  { %v472_v1 = vadd.f32 %v471_v0, %v431_v63 }
 0x29f   :  { %v587_v2 = vpop.f32.mrf.mxu0 }
 0x2a0   :  { %v478_v3 = vsel %vm477_vm4, %v472_v1, -inf }
 0x2a1   :  { %v479_v4 = vrot.slane %v478_v3, 4  ;;  %v474_v5 = vpop.f32.mrf.mxu0 }
 0x2a3   :  { %v480_v6 = vmax.f32 %v478_v3, %v479_v4  ;;  %v588_v7 = vpop.f32.mrf.mxu0 }
 0x2a5   :  { %v481_v8 = vrot.slane %v480_v6, 2 }
 0x2a7   :  { %v482_v9 = vmax.f32 %v480_v6, %v481_v8 }
 0x2a9   :  { %v483_v10 = vrot.slane %v482_v9, 1 }
 0x2ab   :  { %v484_v11 = vmax.f32 %v482_v9, %v483_v10 }
 0x2ad   :  { %v485_v12 = vsub.f32 %v472_v1, %v484_v11 }
 0x2af   :  { %v486_v13 = vmul.f32 1.442695, %v485_v12 }
 0x2b1   :  { %605 = vpow2.f32 %v486_v13 }
 0x2be   :  { %v606_v14 = vpop.eup %605 }
 0x2bf   :  { %v488_v15 = vsel %vm477_vm4, %v606_v14, 0.0 }
 0x2c0   :  { %v489_v16 = vrot.slane %v488_v15, 4 }
 0x2c2   :  { %v490_v17 = vadd.f32 %v489_v16, %v488_v15 }
 0x2c4   :  { %v491_v18 = vrot.slane %v490_v17, 2 }
 0x2c6   :  { %v492_v19 = vadd.f32 %v491_v18, %v490_v17 }
 0x2c8   :  { %v493_v20 = vrot.slane %v492_v19, 1 }
 0x2ca   :  { %v494_v21 = vadd.f32 %v493_v20, %v492_v19 }
 0x2cc   :  { %607 = vrcp.f32 %v494_v21 }
 0x2d9   :  { %v608_v22 = vpop.eup %607 }
 0x2da   :  { %v496_v23 = vmul.f32 %v608_v22, %v606_v14 }
 0x2dc   :  { %497 = vst [vmem:[%s780_s7] sm:$0xf] %v496_v23 }

</bundles_post_ra>
